<compile_context>
chip_gen: v5e
topology: v5e:2x2
jax: 0.10.0
libtpu: 0.0.40
codegen_flags: <defaults>
</compile_context>

<pallas_src>
import jax
import jax.numpy as jnp
from jax.experimental import pallas as pl
from jax.experimental.pallas import tpu as pltpu


def _identity_dma_kernel(x_hbm, o_hbm, sem):
    # Pure identity warp: deformed == canonical.  One full-array HBM->HBM DMA.
    cp = pltpu.make_async_copy(x_hbm, o_hbm, sem)
    cp.start()
    cp.wait()


def _pallas_identity_copy(xyz):
    """Explicit identity copy via a single HBM->HBM DMA inside pallas_call.

    Operates directly on the original (M, N, D, 3) array: no padding, no slab
    reshape, no VMEM round-trip, no tiling constraints, works for any dtype.
    """
    itemsize = jnp.dtype(xyz.dtype).itemsize
    return pl.pallas_call(
        _identity_dma_kernel,
        out_shape=jax.ShapeDtypeStruct(xyz.shape, xyz.dtype),
        in_specs=[pl.BlockSpec(memory_space=pl.ANY)],
        out_specs=pl.BlockSpec(memory_space=pl.ANY),
        scratch_shapes=[pltpu.SemaphoreType.DMA(())],
        cost_estimate=pl.CostEstimate(
            flops=0,
            transcendentals=0,
            bytes_accessed=2 * xyz.size * itemsize,
        ),
    )(xyz)


def identity_warp(xyz, frame_id=None, inst_id=None, backward=False,
                  samples_dict=None, return_aux=False, use_kernel=False):
    """Pallas implementation of IdentityWarp.forward.

    Args:
        xyz: (M, N, D, 3) float array of points in object canonical space.
        frame_id: (M,) int array (unused, matches PyTorch signature).
        inst_id: (M,) int array (unused, matches PyTorch signature).
        backward: unused (identity warp is its own inverse).
        samples_dict: unused (only used by SkeletonWarp in the original code).
        return_aux: if True, also return the (always empty) warp_dict.
        use_kernel: if True, route the identity through an explicit Pallas
            HBM->HBM DMA kernel; otherwise return the input directly (free).
    Returns:
        (M, N, D, 3) warped xyz (== xyz), and optionally an empty aux dict.
    """
    if use_kernel:
        out = _pallas_identity_copy(xyz)
    else:
        # Fast path: identity warp needs no data movement at all.
        out = xyz

    warp_dict = {}
    if return_aux:
        return out, warp_dict
    return out


class IdentityWarpJAX:
    """Mirror of the PyTorch IdentityWarp module (no learnable parameters)."""

    def __init__(self, frame_info, num_freq_xyz=10, num_freq_t=6):
        self.num_frames = frame_info["frame_offset"][-1]
        self.num_inst = len(frame_info["frame_offset"]) - 1

    def __call__(self, xyz, frame_id, inst_id, backward=False,
                 samples_dict=None, return_aux=False, use_kernel=False):
        return identity_warp(xyz, frame_id, inst_id, backward=backward,
                             samples_dict=samples_dict, return_aux=return_aux,
                             use_kernel=use_kernel)

    # TODO(synk): get_template_vis builds trimesh meshes (CPU-side geometry),
    # which has no Pallas equivalent and is omitted.


if __name__ == "__main__":
    key = jax.random.PRNGKey(0)

    # Small shapes consistent with the forward signature: (M, N, D, 3)
    M, N, D = 2, 8, 16
    frame_info = {"frame_offset": [0, 4, 8]}  # 8 frames, 2 instances

    k1, k2, k3 = jax.random.split(key, 3)
    xyz = jax.random.normal(k1, (M, N, D, 3), dtype=jnp.float32)
    frame_id = jax.random.randint(k2, (M,), 0, frame_info["frame_offset"][-1])
    inst_id = jax.random.randint(k3, (M,), 0, len(frame_info["frame_offset"]) - 1)

    warp = IdentityWarpJAX(frame_info)

    # Fast path (the real optimization: no kernel at all).
    out_fast, aux = warp(xyz, frame_id, inst_id, return_aux=True)
    out_fast = jax.block_until_ready(out_fast)

    # Explicit Pallas HBM->HBM DMA path (exercises pallas_call on TPU).
    out_kernel, aux_k = warp(xyz, frame_id, inst_id, return_aux=True,
                             use_kernel=True)
    out_kernel = jax.block_until_ready(out_kernel)

    assert out_fast.shape == xyz.shape and out_fast.dtype == xyz.dtype
    assert out_kernel.shape == xyz.shape and out_kernel.dtype == xyz.dtype
    assert aux == {} and aux_k == {}
    assert bool(jnp.all(out_fast == xyz))
    assert bool(jnp.all(out_kernel == xyz))

    print("KERNEL_OK")
</pallas_src>

<mosaic_0001>
module attributes {stable_mosaic.version = 11 : i64} {
  func.func @_identity_dma_kernel(%arg0: memref<2x8x16x3xf32, #tpu.memory_space<any>>, %arg1: memref<2x8x16x3xf32, #tpu.memory_space<any>>, %arg2: memref<!tpu.dma_semaphore, #tpu.memory_space<semaphore_mem>>) attributes {dimension_semantics = [], scalar_prefetch = 0 : i64, scratch_operands = 1 : i64, tpu.core_type = #tpu.core_type<tc>} {
    tpu.enqueue_dma source(%arg0 : memref<2x8x16x3xf32, #tpu.memory_space<any>>) target(%arg1 : memref<2x8x16x3xf32, #tpu.memory_space<any>>) target_semaphore(%arg2 : memref<!tpu.dma_semaphore, #tpu.memory_space<semaphore_mem>>)
    tpu.wait_dma2 semaphore(%arg2 : memref<!tpu.dma_semaphore, #tpu.memory_space<semaphore_mem>>) src(%arg0 : memref<2x8x16x3xf32, #tpu.memory_space<any>>) dst(%arg1 : memref<2x8x16x3xf32, #tpu.memory_space<any>>)
    return
  }
}

</mosaic_0001>

<bundles_post_ra>
// kernel: tpu_custom_call.1
= control target key start
LH: loop header
LB: loop body
LE: loop exit
PB: predicated region body
PF: predicated region fallthrough
CT: control target
= control target key end

     0   :  { %s306_s0 = inlined_call_operand.vmem [shape: f32[2,8,16,3], index: 0, kind: input, shape index: {}]   ;;  %s307_s1 = inlined_call_operand.vmem [shape: f32[2,8,16,3], index: 1, kind: output, shape index: {}]  }
   0x1   :  { %v16_v0 = vld [vmem:[%s306_s0] sm:$0xff]  ;;  %v18_v1 = vld [vmem:[%s306_s0 + $0x8] sm:$0xff]  ;;  %v20_v2 = vld [vmem:[%s306_s0 + $0x10] sm:$0xff] }
   0x2   :  { %17 = vst [vmem:[%s307_s1] sm:$0xff] %v16_v0  ;;  %v22_v3 = vld [vmem:[%s306_s0 + $0x18] sm:$0xff]  ;;  %v24_v4 = vld [vmem:[%s306_s0 + $0x20] sm:$0xff]  ;;  %v26_v5 = vld [vmem:[%s306_s0 + $0x28] sm:$0xff] }
   0x3   :  { %19 = vst [vmem:[%s307_s1 + $0x8] sm:$0xff] %v18_v1  ;;  %v28_v6 = vld [vmem:[%s306_s0 + $0x30] sm:$0xff]  ;;  %v30_v7 = vld [vmem:[%s306_s0 + $0x38] sm:$0xff]  ;;  %v32_v8 = vld [vmem:[%s306_s0 + $0x40] sm:$0xff] }
   0x4   :  { %21 = vst [vmem:[%s307_s1 + $0x10] sm:$0xff] %v20_v2  ;;  %v34_v9 = vld [vmem:[%s306_s0 + $0x48] sm:$0xff]  ;;  %v36_v10 = vld [vmem:[%s306_s0 + $0x50] sm:$0xff]  ;;  %v38_v11 = vld [vmem:[%s306_s0 + $0x58] sm:$0xff] }
   0x5   :  { %23 = vst [vmem:[%s307_s1 + $0x18] sm:$0xff] %v22_v3  ;;  %v40_v12 = vld [vmem:[%s306_s0 + $0x60] sm:$0xff]  ;;  %v42_v13 = vld [vmem:[%s306_s0 + $0x68] sm:$0xff]  ;;  %v44_v14 = vld [vmem:[%s306_s0 + $0x70] sm:$0xff] }
   0x6   :  { %25 = vst [vmem:[%s307_s1 + $0x20] sm:$0xff] %v24_v4  ;;  %v46_v15 = vld [vmem:[%s306_s0 + $0x78] sm:$0xff]  ;;  %v48_v16 = vld [vmem:[%s306_s0 + $0x80] sm:$0xff]  ;;  %v50_v17 = vld [vmem:[%s306_s0 + $0x88] sm:$0xff] }
   0x7   :  { %27 = vst [vmem:[%s307_s1 + $0x28] sm:$0xff] %v26_v5  ;;  %v52_v18 = vld [vmem:[%s306_s0 + $0x90] sm:$0xff]  ;;  %v54_v19 = vld [vmem:[%s306_s0 + $0x98] sm:$0xff]  ;;  %v56_v20 = vld [vmem:[%s306_s0 + $0xa0] sm:$0xff] }
   0x8   :  { %29 = vst [vmem:[%s307_s1 + $0x30] sm:$0xff] %v28_v6  ;;  %v58_v21 = vld [vmem:[%s306_s0 + $0xa8] sm:$0xff]  ;;  %v60_v22 = vld [vmem:[%s306_s0 + $0xb0] sm:$0xff]  ;;  %v62_v23 = vld [vmem:[%s306_s0 + $0xb8] sm:$0xff] }
   0x9   :  { %31 = vst [vmem:[%s307_s1 + $0x38] sm:$0xff] %v30_v7  ;;  %v64_v24 = vld [vmem:[%s306_s0 + $0xc0] sm:$0xff]  ;;  %v66_v25 = vld [vmem:[%s306_s0 + $0xc8] sm:$0xff]  ;;  %v68_v26 = vld [vmem:[%s306_s0 + $0xd0] sm:$0xff] }
   0xa   :  { %33 = vst [vmem:[%s307_s1 + $0x40] sm:$0xff] %v32_v8  ;;  %v70_v27 = vld [vmem:[%s306_s0 + $0xd8] sm:$0xff]  ;;  %v72_v28 = vld [vmem:[%s306_s0 + $0xe0] sm:$0xff]  ;;  %v74_v29 = vld [vmem:[%s306_s0 + $0xe8] sm:$0xff] }
   0xb   :  { %35 = vst [vmem:[%s307_s1 + $0x48] sm:$0xff] %v34_v9  ;;  %v76_v30 = vld [vmem:[%s306_s0 + $0xf0] sm:$0xff]  ;;  %v78_v31 = vld [vmem:[%s306_s0 + $0xf8] sm:$0xff] }
   0xc   :  { %37 = vst [vmem:[%s307_s1 + $0x50] sm:$0xff] %v36_v10 }
   0xd   :  { %39 = vst [vmem:[%s307_s1 + $0x58] sm:$0xff] %v38_v11 }
   0xe   :  { %41 = vst [vmem:[%s307_s1 + $0x60] sm:$0xff] %v40_v12 }
   0xf   :  { %43 = vst [vmem:[%s307_s1 + $0x68] sm:$0xff] %v42_v13 }
  0x10   :  { %45 = vst [vmem:[%s307_s1 + $0x70] sm:$0xff] %v44_v14 }
  0x11   :  { %47 = vst [vmem:[%s307_s1 + $0x78] sm:$0xff] %v46_v15 }
  0x12   :  { %49 = vst [vmem:[%s307_s1 + $0x80] sm:$0xff] %v48_v16 }
  0x13   :  { %51 = vst [vmem:[%s307_s1 + $0x88] sm:$0xff] %v50_v17 }
  0x14   :  { %53 = vst [vmem:[%s307_s1 + $0x90] sm:$0xff] %v52_v18 }
  0x15   :  { %55 = vst [vmem:[%s307_s1 + $0x98] sm:$0xff] %v54_v19 }
  0x16   :  { %57 = vst [vmem:[%s307_s1 + $0xa0] sm:$0xff] %v56_v20 }
  0x17   :  { %59 = vst [vmem:[%s307_s1 + $0xa8] sm:$0xff] %v58_v21 }
  0x18   :  { %61 = vst [vmem:[%s307_s1 + $0xb0] sm:$0xff] %v60_v22 }
  0x19   :  { %63 = vst [vmem:[%s307_s1 + $0xb8] sm:$0xff] %v62_v23 }
  0x1a   :  { %65 = vst [vmem:[%s307_s1 + $0xc0] sm:$0xff] %v64_v24 }
  0x1b   :  { %67 = vst [vmem:[%s307_s1 + $0xc8] sm:$0xff] %v66_v25 }
  0x1c   :  { %69 = vst [vmem:[%s307_s1 + $0xd0] sm:$0xff] %v68_v26 }
  0x1d   :  { %71 = vst [vmem:[%s307_s1 + $0xd8] sm:$0xff] %v70_v27 }
  0x1e   :  { %73 = vst [vmem:[%s307_s1 + $0xe0] sm:$0xff] %v72_v28 }
  0x1f   :  { %75 = vst [vmem:[%s307_s1 + $0xe8] sm:$0xff] %v74_v29 }
  0x20   :  { %77 = vst [vmem:[%s307_s1 + $0xf0] sm:$0xff] %v76_v30 }
  0x21   :  { %79 = vst [vmem:[%s307_s1 + $0xf8] sm:$0xff] %v78_v31 }
  0x22   :  { %85 = vsyncadd [#allocation2], 4096 }
  0x23   :  { %102 = dma.done.wait [#allocation2], 4096 }
  0x24   :  { %103 = vsyncadd [#allocation2], 4294963200 }
  0x25   :  { %91 = vsyncmov [#allocation2] }
  0x28   :  { %s92_s18 = vpop.sfrf %91 }
  0x29   :  { %p101_p0 = scmp.ne.s32.totalorder %s92_s18, 0 }
  0x2b   :  { %96 = shalt.err (%p101_p0)  }

</bundles_post_ra>
